<compile_context>
chip_gen: v7x
topology: tpu7x:2x2x1
jax: 0.10.0
libtpu: 0.0.40
codegen_flags: <defaults>
</compile_context>

<pallas_src>
import functools

import jax
import jax.numpy as jnp
from jax.experimental import pallas as pl
from jax.experimental.pallas import tpu as pltpu


_CHUNK = 1024          # boxes per grid step = 8 sublanes x 128 lanes
_LANES = 128


# ----------------------------------------------------------------------------
# Pallas kernel: fused 3D-box -> 2D-box projection (one 1024-box chunk / step)
# ----------------------------------------------------------------------------
def _project_kernel(boxes_ref, cam_ref, out_ref):
    # boxes_ref: [8, 8, 128] f32 VMEM; first axis = (x, y, z, w, h, l, yaw, pad)
    # cam_ref  : [12] f32 SMEM = (M00..M03, M10..M13, E20..E23) with
    #            M = K[:2,:3] @ E[:3,:]  (intrinsics folded into extrinsics)
    # out_ref  : [4, 8, 128] f32 VMEM = (x_min, y_min, x_max, y_max)
    x   = boxes_ref[0]                          # [8, 128] -- one full vreg
    y   = boxes_ref[1]
    z   = boxes_ref[2]
    w   = boxes_ref[3]
    h   = boxes_ref[4]
    l   = boxes_ref[5]
    yaw = boxes_ref[6]

    c = jnp.cos(yaw)                            # once per box (not per corner)
    s = jnp.sin(yaw)

    # Half-extents pre-rotated once; reused by all 8 corners.
    lc = (0.5 * l) * c
    ls = (0.5 * l) * s
    wc = (0.5 * w) * c
    ws = (0.5 * w) * s
    hz = 0.5 * h

    # Fused camera constants as SMEM scalars (broadcast muls on the VPU; an
    # MXU formulation would be <4% utilized -- deliberately avoided).
    M00 = cam_ref[0]; M01 = cam_ref[1]; M02 = cam_ref[2];  M03 = cam_ref[3]
    M10 = cam_ref[4]; M11 = cam_ref[5]; M12 = cam_ref[6];  M13 = cam_ref[7]
    E20 = cam_ref[8]; E21 = cam_ref[9]; E22 = cam_ref[10]; E23 = cam_ref[11]

    # The 8 box corners factor into 4 (sx, sy) sign combos x 2 sz signs.
    # Precompute the projection contribution of the (x, y) part and the z
    # part separately, then combine -- signs folded into add/sub (no
    # materialized +-1 constants, full vreg width throughout).
    xy_terms = []
    for sx, sy in ((1.0, 1.0), (1.0, -1.0), (-1.0, -1.0), (-1.0, 1.0)):
        cx = (x + lc) if sx > 0 else (x - lc)
        cx = (cx - ws) if sy > 0 else (cx + ws)
        cy = (y + ls) if sx > 0 else (y - ls)
        cy = (cy + wc) if sy > 0 else (cy - wc)
        xy_terms.append((M00 * cx + M01 * cy,       # U contribution
                         M10 * cx + M11 * cy,       # V contribution
                         E20 * cx + E21 * cy))      # Zc contribution

    z_terms = []
    for sz in (-1.0, 1.0):
        cz = (z + hz) if sz > 0 else (z - hz)
        z_terms.append((M02 * cz + M03,
                        M12 * cz + M13,
                        E22 * cz + E23))

    # Unrolled pairwise min/max tree over the 8 projected corners (VALU only;
    # reciprocal goes to the otherwise-idle EUP slot).
    x_min = y_min = x_max = y_max = None
    for au, av, az in xy_terms:
        for bu, bv, bz in z_terms:
            U  = au + bu
            V  = av + bv
            Zc = az + bz
            inv = pl.reciprocal(Zc, approx=True)
            inv = inv * (2.0 - Zc * inv)            # one Newton step -> ~f32 exact
            u = U * inv
            v = V * inv
            if x_min is None:
                x_min, y_min, x_max, y_max = u, v, u, v
            else:
                x_min = jnp.minimum(x_min, u)
                y_min = jnp.minimum(y_min, v)
                x_max = jnp.maximum(x_max, u)
                y_max = jnp.maximum(y_max, v)

    # Dense full-vreg stores (no single-sublane masked writes).
    out_ref[0] = x_min
    out_ref[1] = y_min
    out_ref[2] = x_max
    out_ref[3] = y_max


# ----------------------------------------------------------------------------
# Wrapper: layout plumbing + pallas_call, fused under jit into one dispatch
# ----------------------------------------------------------------------------
@jax.jit
def _project_impl(boxes_3d, intrinsics, extrinsics):
    n = boxes_3d.shape[0]
    n_chunks = int(pl.cdiv(n, _CHUNK))
    n_pad = n_chunks * _CHUNK

    # Fold intrinsics into extrinsics: M = K[:2,:3] @ E[:3,:]  (2x4).
    e = extrinsics.astype(jnp.float32)
    k = intrinsics.astype(jnp.float32)
    m = k[:2, :3] @ e[:3, :]
    cam = jnp.concatenate([m.reshape(-1), e[2, :]])            # [12] -> SMEM

    # Params along sublanes (8 rows), boxes along lanes; padded z row = 1.0 so
    # the discarded padded lanes keep a finite reciprocal for typical E.
    boxes_t = jnp.zeros((8, n_pad), jnp.float32)
    boxes_t = boxes_t.at[2, :].set(1.0)
    boxes_t = boxes_t.at[:7, :n].set(boxes_3d.astype(jnp.float32).T)
    boxes_t = boxes_t.reshape(8, n_pad // _LANES, _LANES)

    cost = pl.CostEstimate(
        flops=150 * n_pad,                    # setup + 8 corners x ~11 VALU ops
        transcendentals=10 * n_pad,           # sin + cos + 8 reciprocals per box
        bytes_accessed=(8 + 4) * 4 * n_pad + 4 * 12,
    )

    out_t = pl.pallas_call(
        _project_kernel,
        out_shape=jax.ShapeDtypeStruct((4, n_pad // _LANES, _LANES), jnp.float32),
        grid=(n_chunks,),
        in_specs=[
            pl.BlockSpec((8, 8, _LANES), lambda i: (0, i, 0)),            # boxes
            pl.BlockSpec(memory_space=pltpu.MemorySpace.SMEM),            # cam consts
        ],
        out_specs=pl.BlockSpec((4, 8, _LANES), lambda i: (0, i, 0)),
        compiler_params=pltpu.CompilerParams(
            dimension_semantics=("parallel",)),                # both TCs on v7x
        cost_estimate=cost,
    )(boxes_t, cam)

    out = out_t.reshape(4, n_pad)[:, :n].T                     # [N, 4]
    return out


def project_3d_to_2d(boxes_3d, intrinsics, extrinsics):
    """boxes_3d [N,7], intrinsics [3,3], extrinsics [4,4] -> boxes_2d [N,4]."""
    boxes_3d = jnp.asarray(boxes_3d, jnp.float32)
    if boxes_3d.shape[0] == 0:
        return jnp.zeros((0, 4), jnp.float32)
    return _project_impl(boxes_3d,
                         jnp.asarray(intrinsics, jnp.float32),
                         jnp.asarray(extrinsics, jnp.float32))


# ----------------------------------------------------------------------------
# Module wrapper (glue in plain JAX)
# ----------------------------------------------------------------------------
class BEVSAMFusionPallas:
    """JAX/Pallas re-implementation of BEVSAMFusion.forward.

    The SAM2 predictor (set_image / per-box mask prediction) is an external
    pretrained network and is not part of this module's compute graph.
    Single-camera API per the reference module; for multi-camera rigs, stack
    boxes per camera and add a leading "parallel" grid axis over cameras.
    """

    def __call__(self, image, bev_detections, camera_params):
        boxes_2d = project_3d_to_2d(
            bev_detections["boxes_3d"],
            camera_params["intrinsics"],
            camera_params["extrinsics"],
        )
        # TODO(synk): SAM2ImagePredictor (set_image + per-box mask prediction)
        # is an external pretrained model with no Pallas equivalent; masks are
        # returned empty, mirroring the reference's "no detections" branch.
        h, w = image.shape[-2:]
        masks = jnp.zeros((0, h, w), dtype=jnp.float32)
        return {
            "boxes_3d": bev_detections["boxes_3d"],
            "boxes_2d": boxes_2d,
            "masks": masks,
            "scores": bev_detections["scores"],
            "labels": bev_detections["labels"],
        }


# ----------------------------------------------------------------------------
# Pure-JAX reference (mirrors the PyTorch math) for a correctness check
# ----------------------------------------------------------------------------
def _reference_project(boxes_3d, intrinsics, extrinsics):
    x, y, z, w, h, l, yaw = [boxes_3d[:, i:i + 1] for i in range(7)]
    sx = jnp.array([[1., 1., -1., -1., 1., 1., -1., -1.]])
    sy = jnp.array([[1., -1., -1., 1., 1., -1., -1., 1.]])
    sz = jnp.array([[-1., -1., -1., -1., 1., 1., 1., 1.]])
    dx, dy, dz = 0.5 * l * sx, 0.5 * w * sy, 0.5 * h * sz
    c, s = jnp.cos(yaw), jnp.sin(yaw)
    corners = jnp.stack(
        [x + dx * c - dy * s, y + dx * s + dy * c, z + dz], axis=-1)  # [N,8,3]
    ones = jnp.ones_like(corners[..., :1])
    cam = jnp.matmul(jnp.concatenate([corners, ones], -1), extrinsics.T)[..., :3]
    img = jnp.matmul(cam / cam[..., 2:3], intrinsics.T)[..., :2]
    return jnp.stack(
        [img[..., 0].min(-1), img[..., 1].min(-1),
         img[..., 0].max(-1), img[..., 1].max(-1)], axis=-1)


if __name__ == "__main__":
    key = jax.random.PRNGKey(0)
    k_box, k_img, k_sc = jax.random.split(key, 3)

    N = 8          # detections
    B, C, H, W = 2, 3, 16, 16

    # boxes_3d [N,7] = (x, y, z, w, h, l, yaw); keep z positive (in front of cam)
    centers = jax.random.uniform(k_box, (N, 3), minval=-4.0, maxval=4.0)
    centers = centers.at[:, 2].set(jnp.abs(centers[:, 2]) + 6.0)
    dims = jax.random.uniform(k_sc, (N, 3), minval=1.0, maxval=3.0)
    yaws = jax.random.uniform(k_box, (N, 1), minval=-3.1, maxval=3.1)
    boxes_3d = jnp.concatenate([centers, dims, yaws], axis=-1).astype(jnp.float32)

    image = jax.random.normal(k_img, (B, C, H, W), dtype=jnp.float32)
    scores = jax.random.uniform(k_sc, (N,), dtype=jnp.float32)
    labels = jnp.arange(N, dtype=jnp.int32) % 4

    intrinsics = jnp.array(
        [[100.0, 0.0, 8.0],
         [0.0, 100.0, 8.0],
         [0.0, 0.0, 1.0]], dtype=jnp.float32)
    extrinsics = jnp.eye(4, dtype=jnp.float32).at[2, 3].set(1.0)

    fusion = BEVSAMFusionPallas()
    out = fusion(
        image,
        {"boxes_3d": boxes_3d, "scores": scores, "labels": labels},
        {"intrinsics": intrinsics, "extrinsics": extrinsics},
    )
    jax.block_until_ready(out["boxes_2d"])

    ref = _reference_project(boxes_3d, intrinsics, extrinsics)
    assert out["boxes_2d"].shape == (N, 4)
    # Newton-refined reciprocal -> near-exact f32; tolerance is tight.
    assert jnp.allclose(out["boxes_2d"], ref, atol=0.05, rtol=1e-3), (
        out["boxes_2d"], ref)

    print("KERNEL_OK")
</pallas_src>

<mosaic_0001>
module attributes {stable_mosaic.version = 11 : i64} {
  func.func @_project_kernel(%arg0: i32, %arg1: memref<8x8x128xf32, #tpu.memory_space<vmem>>, %arg2: memref<12xf32, #tpu.memory_space<smem>>, %arg3: memref<4x8x128xf32, #tpu.memory_space<vmem>>) attributes {dimension_semantics = [#tpu.dimension_semantics<parallel>], iteration_bounds = array<i64: 1>, scalar_prefetch = 0 : i64, scratch_operands = 0 : i64, tpu.core_type = #tpu.core_type<tc>, window_params = [{transform_indices = @transform_0, window_bounds = array<i64: 8, 8, 128>}, {transform_indices = @transform_1, window_bounds = array<i64: 12>}, {transform_indices = @transform_2, window_bounds = array<i64: 4, 8, 128>}]} {
    %c0 = arith.constant 0 : index
    %c0_0 = arith.constant 0 : index
    %c0_1 = arith.constant 0 : index
    %0 = vector.load %arg1[%c0, %c0_0, %c0_1] : memref<8x8x128xf32, #tpu.memory_space<vmem>>, vector<1x8x128xf32>
    %1 = vector.shape_cast %0 : vector<1x8x128xf32> to vector<8x128xf32>
    %c1 = arith.constant 1 : index
    %c0_2 = arith.constant 0 : index
    %c0_3 = arith.constant 0 : index
    %2 = vector.load %arg1[%c1, %c0_2, %c0_3] : memref<8x8x128xf32, #tpu.memory_space<vmem>>, vector<1x8x128xf32>
    %3 = vector.shape_cast %2 : vector<1x8x128xf32> to vector<8x128xf32>
    %c2 = arith.constant 2 : index
    %c0_4 = arith.constant 0 : index
    %c0_5 = arith.constant 0 : index
    %4 = vector.load %arg1[%c2, %c0_4, %c0_5] : memref<8x8x128xf32, #tpu.memory_space<vmem>>, vector<1x8x128xf32>
    %5 = vector.shape_cast %4 : vector<1x8x128xf32> to vector<8x128xf32>
    %c3 = arith.constant 3 : index
    %c0_6 = arith.constant 0 : index
    %c0_7 = arith.constant 0 : index
    %6 = vector.load %arg1[%c3, %c0_6, %c0_7] : memref<8x8x128xf32, #tpu.memory_space<vmem>>, vector<1x8x128xf32>
    %7 = vector.shape_cast %6 : vector<1x8x128xf32> to vector<8x128xf32>
    %c4 = arith.constant 4 : index
    %c0_8 = arith.constant 0 : index
    %c0_9 = arith.constant 0 : index
    %8 = vector.load %arg1[%c4, %c0_8, %c0_9] : memref<8x8x128xf32, #tpu.memory_space<vmem>>, vector<1x8x128xf32>
    %9 = vector.shape_cast %8 : vector<1x8x128xf32> to vector<8x128xf32>
    %c5 = arith.constant 5 : index
    %c0_10 = arith.constant 0 : index
    %c0_11 = arith.constant 0 : index
    %10 = vector.load %arg1[%c5, %c0_10, %c0_11] : memref<8x8x128xf32, #tpu.memory_space<vmem>>, vector<1x8x128xf32>
    %11 = vector.shape_cast %10 : vector<1x8x128xf32> to vector<8x128xf32>
    %c6 = arith.constant 6 : index
    %c0_12 = arith.constant 0 : index
    %c0_13 = arith.constant 0 : index
    %12 = vector.load %arg1[%c6, %c0_12, %c0_13] : memref<8x8x128xf32, #tpu.memory_space<vmem>>, vector<1x8x128xf32>
    %13 = vector.shape_cast %12 : vector<1x8x128xf32> to vector<8x128xf32>
    %14 = math.cos %13 : vector<8x128xf32>
    %15 = math.sin %13 : vector<8x128xf32>
    %cst = arith.constant 5.000000e-01 : f32
    %16 = vector.broadcast %cst : f32 to vector<8x128xf32>
    %17 = arith.mulf %16, %11 : vector<8x128xf32>
    %18 = arith.mulf %17, %14 : vector<8x128xf32>
    %cst_14 = arith.constant 5.000000e-01 : f32
    %19 = vector.broadcast %cst_14 : f32 to vector<8x128xf32>
    %20 = arith.mulf %19, %11 : vector<8x128xf32>
    %21 = arith.mulf %20, %15 : vector<8x128xf32>
    %cst_15 = arith.constant 5.000000e-01 : f32
    %22 = vector.broadcast %cst_15 : f32 to vector<8x128xf32>
    %23 = arith.mulf %22, %7 : vector<8x128xf32>
    %24 = arith.mulf %23, %14 : vector<8x128xf32>
    %cst_16 = arith.constant 5.000000e-01 : f32
    %25 = vector.broadcast %cst_16 : f32 to vector<8x128xf32>
    %26 = arith.mulf %25, %7 : vector<8x128xf32>
    %27 = arith.mulf %26, %15 : vector<8x128xf32>
    %cst_17 = arith.constant 5.000000e-01 : f32
    %28 = vector.broadcast %cst_17 : f32 to vector<8x128xf32>
    %29 = arith.mulf %28, %9 : vector<8x128xf32>
    %c0_18 = arith.constant 0 : index
    %30 = memref.load %arg2[%c0_18] : memref<12xf32, #tpu.memory_space<smem>>
    %c1_19 = arith.constant 1 : index
    %31 = memref.load %arg2[%c1_19] : memref<12xf32, #tpu.memory_space<smem>>
    %c2_20 = arith.constant 2 : index
    %32 = memref.load %arg2[%c2_20] : memref<12xf32, #tpu.memory_space<smem>>
    %c3_21 = arith.constant 3 : index
    %33 = memref.load %arg2[%c3_21] : memref<12xf32, #tpu.memory_space<smem>>
    %c4_22 = arith.constant 4 : index
    %34 = memref.load %arg2[%c4_22] : memref<12xf32, #tpu.memory_space<smem>>
    %c5_23 = arith.constant 5 : index
    %35 = memref.load %arg2[%c5_23] : memref<12xf32, #tpu.memory_space<smem>>
    %c6_24 = arith.constant 6 : index
    %36 = memref.load %arg2[%c6_24] : memref<12xf32, #tpu.memory_space<smem>>
    %c7 = arith.constant 7 : index
    %37 = memref.load %arg2[%c7] : memref<12xf32, #tpu.memory_space<smem>>
    %c8 = arith.constant 8 : index
    %38 = memref.load %arg2[%c8] : memref<12xf32, #tpu.memory_space<smem>>
    %c9 = arith.constant 9 : index
    %39 = memref.load %arg2[%c9] : memref<12xf32, #tpu.memory_space<smem>>
    %c10 = arith.constant 10 : index
    %40 = memref.load %arg2[%c10] : memref<12xf32, #tpu.memory_space<smem>>
    %c11 = arith.constant 11 : index
    %41 = memref.load %arg2[%c11] : memref<12xf32, #tpu.memory_space<smem>>
    %42 = arith.addf %1, %18 : vector<8x128xf32>
    %43 = arith.subf %42, %27 : vector<8x128xf32>
    %44 = arith.addf %3, %21 : vector<8x128xf32>
    %45 = arith.addf %44, %24 : vector<8x128xf32>
    %46 = vector.broadcast %30 : f32 to vector<8x128xf32>
    %47 = arith.mulf %46, %43 : vector<8x128xf32>
    %48 = vector.broadcast %31 : f32 to vector<8x128xf32>
    %49 = arith.mulf %48, %45 : vector<8x128xf32>
    %50 = arith.addf %47, %49 : vector<8x128xf32>
    %51 = vector.broadcast %34 : f32 to vector<8x128xf32>
    %52 = arith.mulf %51, %43 : vector<8x128xf32>
    %53 = vector.broadcast %35 : f32 to vector<8x128xf32>
    %54 = arith.mulf %53, %45 : vector<8x128xf32>
    %55 = arith.addf %52, %54 : vector<8x128xf32>
    %56 = vector.broadcast %38 : f32 to vector<8x128xf32>
    %57 = arith.mulf %56, %43 : vector<8x128xf32>
    %58 = vector.broadcast %39 : f32 to vector<8x128xf32>
    %59 = arith.mulf %58, %45 : vector<8x128xf32>
    %60 = arith.addf %57, %59 : vector<8x128xf32>
    %61 = arith.addf %1, %18 : vector<8x128xf32>
    %62 = arith.addf %61, %27 : vector<8x128xf32>
    %63 = arith.addf %3, %21 : vector<8x128xf32>
    %64 = arith.subf %63, %24 : vector<8x128xf32>
    %65 = vector.broadcast %30 : f32 to vector<8x128xf32>
    %66 = arith.mulf %65, %62 : vector<8x128xf32>
    %67 = vector.broadcast %31 : f32 to vector<8x128xf32>
    %68 = arith.mulf %67, %64 : vector<8x128xf32>
    %69 = arith.addf %66, %68 : vector<8x128xf32>
    %70 = vector.broadcast %34 : f32 to vector<8x128xf32>
    %71 = arith.mulf %70, %62 : vector<8x128xf32>
    %72 = vector.broadcast %35 : f32 to vector<8x128xf32>
    %73 = arith.mulf %72, %64 : vector<8x128xf32>
    %74 = arith.addf %71, %73 : vector<8x128xf32>
    %75 = vector.broadcast %38 : f32 to vector<8x128xf32>
    %76 = arith.mulf %75, %62 : vector<8x128xf32>
    %77 = vector.broadcast %39 : f32 to vector<8x128xf32>
    %78 = arith.mulf %77, %64 : vector<8x128xf32>
    %79 = arith.addf %76, %78 : vector<8x128xf32>
    %80 = arith.subf %1, %18 : vector<8x128xf32>
    %81 = arith.addf %80, %27 : vector<8x128xf32>
    %82 = arith.subf %3, %21 : vector<8x128xf32>
    %83 = arith.subf %82, %24 : vector<8x128xf32>
    %84 = vector.broadcast %30 : f32 to vector<8x128xf32>
    %85 = arith.mulf %84, %81 : vector<8x128xf32>
    %86 = vector.broadcast %31 : f32 to vector<8x128xf32>
    %87 = arith.mulf %86, %83 : vector<8x128xf32>
    %88 = arith.addf %85, %87 : vector<8x128xf32>
    %89 = vector.broadcast %34 : f32 to vector<8x128xf32>
    %90 = arith.mulf %89, %81 : vector<8x128xf32>
    %91 = vector.broadcast %35 : f32 to vector<8x128xf32>
    %92 = arith.mulf %91, %83 : vector<8x128xf32>
    %93 = arith.addf %90, %92 : vector<8x128xf32>
    %94 = vector.broadcast %38 : f32 to vector<8x128xf32>
    %95 = arith.mulf %94, %81 : vector<8x128xf32>
    %96 = vector.broadcast %39 : f32 to vector<8x128xf32>
    %97 = arith.mulf %96, %83 : vector<8x128xf32>
    %98 = arith.addf %95, %97 : vector<8x128xf32>
    %99 = arith.subf %1, %18 : vector<8x128xf32>
    %100 = arith.subf %99, %27 : vector<8x128xf32>
    %101 = arith.subf %3, %21 : vector<8x128xf32>
    %102 = arith.addf %101, %24 : vector<8x128xf32>
    %103 = vector.broadcast %30 : f32 to vector<8x128xf32>
    %104 = arith.mulf %103, %100 : vector<8x128xf32>
    %105 = vector.broadcast %31 : f32 to vector<8x128xf32>
    %106 = arith.mulf %105, %102 : vector<8x128xf32>
    %107 = arith.addf %104, %106 : vector<8x128xf32>
    %108 = vector.broadcast %34 : f32 to vector<8x128xf32>
    %109 = arith.mulf %108, %100 : vector<8x128xf32>
    %110 = vector.broadcast %35 : f32 to vector<8x128xf32>
    %111 = arith.mulf %110, %102 : vector<8x128xf32>
    %112 = arith.addf %109, %111 : vector<8x128xf32>
    %113 = vector.broadcast %38 : f32 to vector<8x128xf32>
    %114 = arith.mulf %113, %100 : vector<8x128xf32>
    %115 = vector.broadcast %39 : f32 to vector<8x128xf32>
    %116 = arith.mulf %115, %102 : vector<8x128xf32>
    %117 = arith.addf %114, %116 : vector<8x128xf32>
    %118 = arith.subf %5, %29 : vector<8x128xf32>
    %119 = vector.broadcast %32 : f32 to vector<8x128xf32>
    %120 = arith.mulf %119, %118 : vector<8x128xf32>
    %121 = vector.broadcast %33 : f32 to vector<8x128xf32>
    %122 = arith.addf %120, %121 : vector<8x128xf32>
    %123 = vector.broadcast %36 : f32 to vector<8x128xf32>
    %124 = arith.mulf %123, %118 : vector<8x128xf32>
    %125 = vector.broadcast %37 : f32 to vector<8x128xf32>
    %126 = arith.addf %124, %125 : vector<8x128xf32>
    %127 = vector.broadcast %40 : f32 to vector<8x128xf32>
    %128 = arith.mulf %127, %118 : vector<8x128xf32>
    %129 = vector.broadcast %41 : f32 to vector<8x128xf32>
    %130 = arith.addf %128, %129 : vector<8x128xf32>
    %131 = arith.addf %5, %29 : vector<8x128xf32>
    %132 = vector.broadcast %32 : f32 to vector<8x128xf32>
    %133 = arith.mulf %132, %131 : vector<8x128xf32>
    %134 = vector.broadcast %33 : f32 to vector<8x128xf32>
    %135 = arith.addf %133, %134 : vector<8x128xf32>
    %136 = vector.broadcast %36 : f32 to vector<8x128xf32>
    %137 = arith.mulf %136, %131 : vector<8x128xf32>
    %138 = vector.broadcast %37 : f32 to vector<8x128xf32>
    %139 = arith.addf %137, %138 : vector<8x128xf32>
    %140 = vector.broadcast %40 : f32 to vector<8x128xf32>
    %141 = arith.mulf %140, %131 : vector<8x128xf32>
    %142 = vector.broadcast %41 : f32 to vector<8x128xf32>
    %143 = arith.addf %141, %142 : vector<8x128xf32>
    %144 = arith.addf %50, %122 : vector<8x128xf32>
    %145 = arith.addf %55, %126 : vector<8x128xf32>
    %146 = arith.addf %60, %130 : vector<8x128xf32>
    %147 = tpu.reciprocal %146 {approx = true} : vector<8x128xf32> -> vector<8x128xf32>
    %148 = arith.mulf %146, %147 : vector<8x128xf32>
    %cst_25 = arith.constant 2.000000e+00 : f32
    %149 = vector.broadcast %cst_25 : f32 to vector<8x128xf32>
    %150 = arith.subf %149, %148 : vector<8x128xf32>
    %151 = arith.mulf %147, %150 : vector<8x128xf32>
    %152 = arith.mulf %144, %151 : vector<8x128xf32>
    %153 = arith.mulf %145, %151 : vector<8x128xf32>
    %154 = arith.addf %50, %135 : vector<8x128xf32>
    %155 = arith.addf %55, %139 : vector<8x128xf32>
    %156 = arith.addf %60, %143 : vector<8x128xf32>
    %157 = tpu.reciprocal %156 {approx = true} : vector<8x128xf32> -> vector<8x128xf32>
    %158 = arith.mulf %156, %157 : vector<8x128xf32>
    %cst_26 = arith.constant 2.000000e+00 : f32
    %159 = vector.broadcast %cst_26 : f32 to vector<8x128xf32>
    %160 = arith.subf %159, %158 : vector<8x128xf32>
    %161 = arith.mulf %157, %160 : vector<8x128xf32>
    %162 = arith.mulf %154, %161 : vector<8x128xf32>
    %163 = arith.mulf %155, %161 : vector<8x128xf32>
    %164 = arith.minimumf %152, %162 : vector<8x128xf32>
    %165 = arith.minimumf %153, %163 : vector<8x128xf32>
    %166 = arith.maximumf %152, %162 : vector<8x128xf32>
    %167 = arith.maximumf %153, %163 : vector<8x128xf32>
    %168 = arith.addf %69, %122 : vector<8x128xf32>
    %169 = arith.addf %74, %126 : vector<8x128xf32>
    %170 = arith.addf %79, %130 : vector<8x128xf32>
    %171 = tpu.reciprocal %170 {approx = true} : vector<8x128xf32> -> vector<8x128xf32>
    %172 = arith.mulf %170, %171 : vector<8x128xf32>
    %cst_27 = arith.constant 2.000000e+00 : f32
    %173 = vector.broadcast %cst_27 : f32 to vector<8x128xf32>
    %174 = arith.subf %173, %172 : vector<8x128xf32>
    %175 = arith.mulf %171, %174 : vector<8x128xf32>
    %176 = arith.mulf %168, %175 : vector<8x128xf32>
    %177 = arith.mulf %169, %175 : vector<8x128xf32>
    %178 = arith.minimumf %164, %176 : vector<8x128xf32>
    %179 = arith.minimumf %165, %177 : vector<8x128xf32>
    %180 = arith.maximumf %166, %176 : vector<8x128xf32>
    %181 = arith.maximumf %167, %177 : vector<8x128xf32>
    %182 = arith.addf %69, %135 : vector<8x128xf32>
    %183 = arith.addf %74, %139 : vector<8x128xf32>
    %184 = arith.addf %79, %143 : vector<8x128xf32>
    %185 = tpu.reciprocal %184 {approx = true} : vector<8x128xf32> -> vector<8x128xf32>
    %186 = arith.mulf %184, %185 : vector<8x128xf32>
    %cst_28 = arith.constant 2.000000e+00 : f32
    %187 = vector.broadcast %cst_28 : f32 to vector<8x128xf32>
    %188 = arith.subf %187, %186 : vector<8x128xf32>
    %189 = arith.mulf %185, %188 : vector<8x128xf32>
    %190 = arith.mulf %182, %189 : vector<8x128xf32>
    %191 = arith.mulf %183, %189 : vector<8x128xf32>
    %192 = arith.minimumf %178, %190 : vector<8x128xf32>
    %193 = arith.minimumf %179, %191 : vector<8x128xf32>
    %194 = arith.maximumf %180, %190 : vector<8x128xf32>
    %195 = arith.maximumf %181, %191 : vector<8x128xf32>
    %196 = arith.addf %88, %122 : vector<8x128xf32>
    %197 = arith.addf %93, %126 : vector<8x128xf32>
    %198 = arith.addf %98, %130 : vector<8x128xf32>
    %199 = tpu.reciprocal %198 {approx = true} : vector<8x128xf32> -> vector<8x128xf32>
    %200 = arith.mulf %198, %199 : vector<8x128xf32>
    %cst_29 = arith.constant 2.000000e+00 : f32
    %201 = vector.broadcast %cst_29 : f32 to vector<8x128xf32>
    %202 = arith.subf %201, %200 : vector<8x128xf32>
    %203 = arith.mulf %199, %202 : vector<8x128xf32>
    %204 = arith.mulf %196, %203 : vector<8x128xf32>
    %205 = arith.mulf %197, %203 : vector<8x128xf32>
    %206 = arith.minimumf %192, %204 : vector<8x128xf32>
    %207 = arith.minimumf %193, %205 : vector<8x128xf32>
    %208 = arith.maximumf %194, %204 : vector<8x128xf32>
    %209 = arith.maximumf %195, %205 : vector<8x128xf32>
    %210 = arith.addf %88, %135 : vector<8x128xf32>
    %211 = arith.addf %93, %139 : vector<8x128xf32>
    %212 = arith.addf %98, %143 : vector<8x128xf32>
    %213 = tpu.reciprocal %212 {approx = true} : vector<8x128xf32> -> vector<8x128xf32>
    %214 = arith.mulf %212, %213 : vector<8x128xf32>
    %cst_30 = arith.constant 2.000000e+00 : f32
    %215 = vector.broadcast %cst_30 : f32 to vector<8x128xf32>
    %216 = arith.subf %215, %214 : vector<8x128xf32>
    %217 = arith.mulf %213, %216 : vector<8x128xf32>
    %218 = arith.mulf %210, %217 : vector<8x128xf32>
    %219 = arith.mulf %211, %217 : vector<8x128xf32>
    %220 = arith.minimumf %206, %218 : vector<8x128xf32>
    %221 = arith.minimumf %207, %219 : vector<8x128xf32>
    %222 = arith.maximumf %208, %218 : vector<8x128xf32>
    %223 = arith.maximumf %209, %219 : vector<8x128xf32>
    %224 = arith.addf %107, %122 : vector<8x128xf32>
    %225 = arith.addf %112, %126 : vector<8x128xf32>
    %226 = arith.addf %117, %130 : vector<8x128xf32>
    %227 = tpu.reciprocal %226 {approx = true} : vector<8x128xf32> -> vector<8x128xf32>
    %228 = arith.mulf %226, %227 : vector<8x128xf32>
    %cst_31 = arith.constant 2.000000e+00 : f32
    %229 = vector.broadcast %cst_31 : f32 to vector<8x128xf32>
    %230 = arith.subf %229, %228 : vector<8x128xf32>
    %231 = arith.mulf %227, %230 : vector<8x128xf32>
    %232 = arith.mulf %224, %231 : vector<8x128xf32>
    %233 = arith.mulf %225, %231 : vector<8x128xf32>
    %234 = arith.minimumf %220, %232 : vector<8x128xf32>
    %235 = arith.minimumf %221, %233 : vector<8x128xf32>
    %236 = arith.maximumf %222, %232 : vector<8x128xf32>
    %237 = arith.maximumf %223, %233 : vector<8x128xf32>
    %238 = arith.addf %107, %135 : vector<8x128xf32>
    %239 = arith.addf %112, %139 : vector<8x128xf32>
    %240 = arith.addf %117, %143 : vector<8x128xf32>
    %241 = tpu.reciprocal %240 {approx = true} : vector<8x128xf32> -> vector<8x128xf32>
    %242 = arith.mulf %240, %241 : vector<8x128xf32>
    %cst_32 = arith.constant 2.000000e+00 : f32
    %243 = vector.broadcast %cst_32 : f32 to vector<8x128xf32>
    %244 = arith.subf %243, %242 : vector<8x128xf32>
    %245 = arith.mulf %241, %244 : vector<8x128xf32>
    %246 = arith.mulf %238, %245 : vector<8x128xf32>
    %247 = arith.mulf %239, %245 : vector<8x128xf32>
    %248 = arith.minimumf %234, %246 : vector<8x128xf32>
    %249 = arith.minimumf %235, %247 : vector<8x128xf32>
    %250 = arith.maximumf %236, %246 : vector<8x128xf32>
    %251 = arith.maximumf %237, %247 : vector<8x128xf32>
    %c0_33 = arith.constant 0 : index
    %c0_34 = arith.constant 0 : index
    %c0_35 = arith.constant 0 : index
    %252 = vector.load %arg3[%c0_33, %c0_34, %c0_35] : memref<4x8x128xf32, #tpu.memory_space<vmem>>, vector<1x8x128xf32>
    %253 = vector.shape_cast %252 : vector<1x8x128xf32> to vector<8x128xf32>
    %254 = vector.shape_cast %248 : vector<8x128xf32> to vector<1x8x128xf32>
    tpu.vector_store %arg3[%c0_33, %c0_34, %c0_35], %254 {strides = array<i32>} : memref<4x8x128xf32, #tpu.memory_space<vmem>>, vector<1x8x128xf32>,
    %c1_36 = arith.constant 1 : index
    %c0_37 = arith.constant 0 : index
    %c0_38 = arith.constant 0 : index
    %255 = vector.load %arg3[%c1_36, %c0_37, %c0_38] : memref<4x8x128xf32, #tpu.memory_space<vmem>>, vector<1x8x128xf32>
    %256 = vector.shape_cast %255 : vector<1x8x128xf32> to vector<8x128xf32>
    %257 = vector.shape_cast %249 : vector<8x128xf32> to vector<1x8x128xf32>
    tpu.vector_store %arg3[%c1_36, %c0_37, %c0_38], %257 {strides = array<i32>} : memref<4x8x128xf32, #tpu.memory_space<vmem>>, vector<1x8x128xf32>,
    %c2_39 = arith.constant 2 : index
    %c0_40 = arith.constant 0 : index
    %c0_41 = arith.constant 0 : index
    %258 = vector.load %arg3[%c2_39, %c0_40, %c0_41] : memref<4x8x128xf32, #tpu.memory_space<vmem>>, vector<1x8x128xf32>
    %259 = vector.shape_cast %258 : vector<1x8x128xf32> to vector<8x128xf32>
    %260 = vector.shape_cast %250 : vector<8x128xf32> to vector<1x8x128xf32>
    tpu.vector_store %arg3[%c2_39, %c0_40, %c0_41], %260 {strides = array<i32>} : memref<4x8x128xf32, #tpu.memory_space<vmem>>, vector<1x8x128xf32>,
    %c3_42 = arith.constant 3 : index
    %c0_43 = arith.constant 0 : index
    %c0_44 = arith.constant 0 : index
    %261 = vector.load %arg3[%c3_42, %c0_43, %c0_44] : memref<4x8x128xf32, #tpu.memory_space<vmem>>, vector<1x8x128xf32>
    %262 = vector.shape_cast %261 : vector<1x8x128xf32> to vector<8x128xf32>
    %263 = vector.shape_cast %251 : vector<8x128xf32> to vector<1x8x128xf32>
    tpu.vector_store %arg3[%c3_42, %c0_43, %c0_44], %263 {strides = array<i32>} : memref<4x8x128xf32, #tpu.memory_space<vmem>>, vector<1x8x128xf32>,
    return
  }
  func.func @transform_0(%arg0: i32) -> (i32, i32, i32) {
    %c0_i32 = arith.constant 0 : i32
    %c0_i32_0 = arith.constant 0 : i32
    %c0_i32_1 = arith.constant 0 : i32
    return %c0_i32, %arg0, %c0_i32_0 : i32, i32, i32
  }
  func.func @transform_1(%arg0: i32) -> i32 {
    %c0_i32 = arith.constant 0 : i32
    %c0_i32_0 = arith.constant 0 : i32
    return %c0_i32 : i32
  }
  func.func @transform_2(%arg0: i32) -> (i32, i32, i32) {
    %c0_i32 = arith.constant 0 : i32
    %c0_i32_0 = arith.constant 0 : i32
    %c0_i32_1 = arith.constant 0 : i32
    return %c0_i32, %arg0, %c0_i32_0 : i32, i32, i32
  }
}

</mosaic_0001>

<bundles_post_ra>
// kernel: _project_impl.1
= control target key start
LH: loop header
LB: loop body
LE: loop exit
PB: predicated region body
PF: predicated region fallthrough
CT: control target
= control target key end

     0   :  { %7 = vsyncpa [#allocation3], 0  ;;  %s663_s0 = inlined_call_operand.vmem [shape: f32[8,8,128], index: 0, kind: input, shape index: {}]   ;;  %s664_s1 = inlined_call_operand.vmem [shape: f32[12], index: 1, kind: input, shape index: {}]   ;;  %s665_s2 = inlined_call_operand.vmem [shape: f32[4,8,128], index: 2, kind: output, shape index: {}]  }
   0x1   :  { %s16_s11 = sshll.u32 %s664_s1, 4  ;;  %s17_s11 = int_to_ptr.vmem [resolvable:$true] %s16_s11 }
   0x2   :  { %s508_s12 = scalar_lea.vmem %s17_s11, 16  ;;  %p513_p1 = scmp.lt.s32.totalorder %s17_s11, %s17_s11 }
   0x3   :  { %p509_p0 = scmp.ne.s32.totalorder %s17_s11, %s508_s12  ;;  %p514_p2 = scmp.lt.s32.totalorder %s508_s12, %s508_s12 }
   0x5   :  { %p515_p3 = por %p514_p2, %p513_p1 }
   0x7   :  { %p516_p4 = pnand %p515_p3, %p509_p0 }
   0x9   :  { %519 = shalt.err (!%p516_p4)
}
   0xa   :  { %s522_s13 = smov [#allocation2]  }
   0xb   :  { %19 = dma.vmem_to_smem %s17_s11, 16, %s522_s13, [#allocation3]  }
   0xc   :  { %520 = dma.done.wait [#allocation3], 16  }
   0xd   :  { %521 = vsyncadd [#allocation3], 4294967280 }
   0xe   :  { %23 = sfence }
   0xf   :  { %v550_v0 = vld [vmem:[%s663_s0 + $0x30] sm:$0xff]  ;;  %v523_v12 = vmov 683565275   ;;  %v524_v14 = vmov 2475754826   ;;  %s579_s21 = sld [smem:[#allocation2 + $0xa]] }
  0x10   :  { %v40_v1 = vand.u32 2139095040, %v550_v0  ;;  %v37_v3 = vand.u32 2147483647, %v550_v0  ;;  %v525_v16 = vmov 2131351028   ;;  %vm39_vm7 = vcmp.lt.s32.totalorder %v550_v0, 0 }
  0x11   :  { %v526_v18 = vmov 2102212464   ;;  %v527_v20 = vmov 920167782   ;;  %v528_v27 = vmov 1326507024   ;;  %vm129_vm15 = vweird.f32 %v550_v0 }
  0x12   :  { %v41_v2 = vshrl.u32 %v40_v1, 23  ;;  %v44_v6 = vand.u32 8388607, %v37_v3  ;;  %vm38_vm8 = vcmp.le.f32.partialorder %v37_v3, 0.7853982  ;;  %v451_v3 = vld [vmem:[%s663_s0 + $0x18] sm:$0xff] }
  0x13   :  { %s582_s22 = sld [smem:[#allocation2 + $0x8]]  ;;  %s584_s23 = sld [smem:[#allocation2 + $0x9]] }
  0x14   :  { %v455_v4 = vadd.s32 4294967169, %v41_v2  ;;  %v45_v9 = vor.u32 8388608, %v44_v6  ;;  %s589_s26 = sld [smem:[#allocation2 + $0x2]]  ;;  %s601_s3 = sld [smem:[#allocation2]] }
  0x15   :  { %s463_s4 = sld [smem:[#allocation2 + $0x1]]  ;;  %s603_s5 = sld [smem:[#allocation2 + $0xb]] }
  0x16   :  { %v47_v5 = vadd.s32 1, %v455_v4  ;;  %v85_v29 = vshll.u32 %v45_v9, 8  ;;  %s605_s6 = sld [smem:[#allocation2 + $0x6]]  ;;  %s609_s7 = sld [smem:[#allocation2 + $0x4]] }
  0x17   :  { %s467_s8 = sld [smem:[#allocation2 + $0x5]]  ;;  %s614_s9 = sld [smem:[#allocation2 + $0x7]] }
  0x18   :  { %vm48_vm0 = vcmp.gt.s32.totalorder %v47_v5, 0 }
  0x19   :  { %v49_v7 = vsel %vm48_vm0, %v47_v5, 0 }
  0x1a   :  { %v51_v8 = vand.u32 31, %v49_v7  ;;  %v50_v10 = vshrl.u32 %v49_v7, 5 }
  0x1c   :  { %v52_v11 = vsub.s32 32, %v51_v8  ;;  %v54_v13 = vshll.u32 %v523_v12, %v51_v8  ;;  %v57_v15 = vshll.u32 %v524_v14, %v51_v8  ;;  %v60_v17 = vshll.u32 %v525_v16, %v51_v8 }
  0x1d   :  { %v63_v19 = vshll.u32 %v526_v18, %v51_v8  ;;  %v66_v21 = vshll.u32 %v527_v20, %v51_v8  ;;  %vm69_vm1 = vcmp.lt.s32.totalorder %v50_v10, 1  ;;  %vm72_vm2 = vcmp.lt.s32.totalorder %v50_v10, 4 }
  0x1e   :  { %v53_v22 = vshrl.u32 %v523_v12, %v52_v11  ;;  %v55_v23 = vshrl.u32 %v524_v14, %v52_v11  ;;  %v58_v24 = vshrl.u32 %v525_v16, %v52_v11  ;;  %v61_v25 = vshrl.u32 %v526_v18, %v52_v11 }
  0x1f   :  { %v64_v26 = vshrl.u32 %v527_v20, %v52_v11  ;;  %v67_v28 = vshrl.u32 %v528_v27, %v52_v11  ;;  %vm70_vm3 = vcmp.lt.s32.totalorder %v50_v10, 2  ;;  %vm71_vm4 = vcmp.lt.s32.totalorder %v50_v10, 3 }
  0x20   :  { %v56_v30 = vor.u32 %v55_v23, %v54_v13  ;;  %v59_v31 = vor.u32 %v58_v24, %v57_v15  ;;  %v62_v32 = vor.u32 %v61_v25, %v60_v17  ;;  %v453_v23 = vld [vmem:[%s663_s0 + $0x28] sm:$0xff] }
  0x21   :  { %v65_v33 = vor.u32 %v64_v26, %v63_v19  ;;  %v68_v34 = vor.u32 %v67_v28, %v66_v21  ;;  %v452_v26 = vld [vmem:[%s663_s0 + $0x20] sm:$0xff] }
  0x22   :  { %v73_v35 = vsel %vm69_vm1, %v53_v22, %v56_v30  ;;  %v74_v36 = vsel %vm72_vm2, %v62_v32, 2102212464  ;;  %v77_v37 = vsel %vm69_vm1, %v56_v30, %v59_v31  ;;  %v81_v38 = vsel %vm69_vm1, %v59_v31, %v62_v32 }
  0x23   :  { %v75_v39 = vsel %vm71_vm4, %v59_v31, %v74_v36  ;;  %v78_v40 = vsel %vm72_vm2, %v65_v33, 920167782  ;;  %v82_v41 = vsel %vm72_vm2, %v68_v34, 1326507024 }
  0x24   :  { %v79_v42 = vsel %vm71_vm4, %v62_v32, %v78_v40  ;;  %v83_v43 = vsel %vm71_vm4, %v65_v33, %v82_v41  ;;  %v76_v44 = vsel %vm70_vm3, %v73_v35, %v75_v39  ;;  %v247_v32 = vmul.f32 0.5, %v451_v3  ;;  %v24_v35 = vld [vmem:[%s663_s0] sm:$0xff]  ;;  %v449_v39 = vld [vmem:[%s663_s0 + $0x8] sm:$0xff]  ;;  %v450_v40 = vld [vmem:[%s663_s0 + $0x10] sm:$0xff]  ;;  %s607_s0 = sld [smem:[#allocation2 + $0x3]] }
  0x25   :  { %v80_v45 = vsel %vm70_vm3, %v77_v37, %v79_v42  ;;  %v84_v46 = vsel %vm70_vm3, %v81_v38, %v83_v43  ;;  %v92_v51 = vmul.u32 %v85_v29, %v76_v44  ;;  %v250_v38 = vmul.f32 0.5, %v452_v26 }
  0x26   :  { %v556_v47 = vmul.u32.u64.low %v85_v29, %v84_v46  ;;  %v557_v48 = vmul.u32.u64.high %v85_v29, %v84_v46, %v556_v47  ;;  %v559_v49 = vmul.u32.u64.low %v85_v29, %v80_v45  ;;  %v560_v50 = vmul.u32.u64.high %v85_v29, %v80_v45, %v559_v49 }
  0x27   :  { %v244_v29 = vmul.f32 0.5, %v453_v23  ;;  %v324_v3 = vstv %s614_s9 }
  0x28   :  { %vm94_vm5 = vc.u32 %v557_v48, %v559_v49  ;;  %v95_v52 = vadd.s32 1, %v560_v50  ;;  %v93_v63 = vadd.s32 %v559_v49, %v557_v48  ;;  %v317_v48 = vsub.f32 %v450_v40, %v250_v38 }
  0x2a   :  { %v96_v53 = vsel %vm94_vm5, %v95_v52, %v560_v50  ;;  %v330_v52 = vadd.f32 %v450_v40, %v250_v38 }
  0x2b   :  { %v97_v54 = vadd.s32 %v96_v53, %v92_v51  ;;  %v326_v51 = vstv %s579_s21 }
  0x2d   :  { %v98_v55 = vadd.s32 536870912, %v97_v54 }
  0x2f   :  { %v99_v56 = vshrl.u32 %v98_v55, 30  ;;  %v277_v55 = vstv %s582_s22 }
  0x31   :  { %v100_v57 = vshll.u32 %v99_v56, 30  ;;  %v123_v13 = vsub.s32 4, %v99_v56 }
  0x33   :  { %v101_v58 = vsub.s32 %v97_v54, %v100_v57  ;;  %v124_v16 = vsel %vm39_vm7, %v123_v13, %v99_v56  ;;  %v279_v56 = vstv %s584_s23 }
  0x34   :  { %v126_v19 = vsel %vm38_vm8, 0, %v124_v16 }
  0x35   :  { %v103_v59 = vsub.s32 0, %v101_v58  ;;  %v233_v20 = vadd.s32 3, %v126_v19  ;;  %v130_v21 = vand.u32 3, %v126_v19  ;;  %v274_v19 = vstv %s467_s8 }
  0x37   :  { %v456_v60 = vmin.u32 %v103_v59, %v101_v58  ;;  %v234_v22 = vand.u32 3, %v233_v20  ;;  %vm135_vm9 = vcmp.eq.s32.totalorder %v130_v21, 2  ;;  %vm132_vm11 = vcmp.eq.s32.totalorder %v130_v21, 0 }
  0x38   :  { %vm131_vm13 = vcmp.lt.s32.totalorder %v130_v21, 2  ;;  %v318_v59 = vstv %s589_s26 }
  0x39   :  { %v105_v61 = vclz %v456_v60  ;;  %vm239_vm10 = vcmp.eq.s32.totalorder %v234_v22, 2  ;;  %vm236_vm12 = vcmp.eq.s32.totalorder %v234_v22, 0  ;;  %vm235_vm14 = vcmp.lt.s32.totalorder %v234_v22, 2 }
  0x3a   :  { %v327_v60 = vmul.f32 %v326_v51, %v317_v48  ;;  %v319_v13 = vmul.f32 %v318_v59, %v317_v48  ;;  %v331_v21 = vmul.f32 %v330_v52, %v318_v59 }
  0x3b   :  { %v457_v62 = vadd.s32 4294967294, %v105_v61 }
  0x3d   :  { %vm458_vm6 = vcmp.lt.s32.totalorder %v457_v62, 0 }
  0x3e   :  { %v108_v1 = vsel %vm458_vm6, 0, %v457_v62 }
  0x3f   :  { %v109_v2 = vsub.s32 32, %v108_v1  ;;  %v110_v4 = vshll.u32 %v101_v58, %v108_v1  ;;  %v113_v5 = vsub.s32 4294967266, %v108_v1 }
  0x41   :  { %v111_v6 = vshrl.u32 %v93_v63, %v109_v2  ;;  %v114_v7 = vadd.s32 127, %v113_v5  ;;  %v267_v2 = vstv %s601_s3  ;;  %v328_v5 = vstv %s603_s5 }
  0x43   :  { %v112_v8 = vor.u32 %v111_v6, %v110_v4  ;;  %v115_v9 = vshll.u32 %v114_v7, 23  ;;  %v269_v4 = vstv %s463_s4  ;;  %v335_v6 = vmul.f32 %v330_v52, %v326_v51 }
  0x45   :  { %v116_v10 = vor.u32 4788187, %v115_v9  ;;  %v119_v11 = vcvt.s32.f32 %v112_v8  ;;  %v336_v22 = vadd.f32 %v335_v6, %v328_v5 }
  0x47   :  { %v117_v12 = vand.u32 2147483647, %v116_v10  ;;  %v322_v10 = vstv %s605_s6 }
  0x48   :  { %v323_v20 = vmul.f32 %v322_v10, %v317_v48 }
  0x49   :  { %v120_v14 = vmul.f32 %v119_v11, %v117_v12  ;;  %v272_v11 = vstv %s609_s7 }
  0x4b   :  { %v121_v15 = vxor.u32 2147483648, %v120_v14 }
  0x4d   :  { %v122_v17 = vsel %vm39_vm7, %v121_v15, %v120_v14  ;;  %v320_v14 = vstv %s607_s0 }
  0x4e   :  { %v125_v18 = vsel %vm38_vm8, %v550_v0, %v122_v17 }
  0x4f   :  { %488 = vcosq.f32 %v125_v18 }
  0x50   :  { %490 = vsinq.f32 %v125_v18  ;;  %v329_v18 = vadd.f32 %v328_v5, %v327_v60 }
  0x59   :  { %v489_v24 = vpop.eup %488 }
  0x5a   :  { %v491_v25 = vpop.eup %490  ;;  %v136_v27 = vxor.u32 2147483648, %v489_v24 }
  0x5b   :  { %v133_v28 = vxor.u32 2147483648, %v491_v25 }
  0x5c   :  { %v137_v30 = vsel %vm135_vm9, %v136_v27, %v491_v25  ;;  %v241_v31 = vsel %vm239_vm10, %v136_v27, %v491_v25 }
  0x5d   :  { %v134_v33 = vsel %vm132_vm11, %v489_v24, %v133_v28  ;;  %v238_v34 = vsel %vm236_vm12, %v489_v24, %v133_v28  ;;  %v623_v28 = vadd.f32 %v320_v14, %v319_v13 }
  0x5e   :  { %v138_v36 = vsel %vm131_vm13, %v134_v33, %v137_v30  ;;  %v242_v37 = vsel %vm235_vm14, %v238_v34, %v241_v31  ;;  %v625_v33 = vadd.f32 %v324_v3, %v323_v20  ;;  %v627_v34 = vadd.f32 %v331_v21, %v320_v14 }
  0x5f   :  { %v139_v41 = vsel %vm129_vm15, nan, %v138_v36  ;;  %v243_v42 = vsel %vm129_vm15, nan, %v242_v37 }
  0x60   :  { %v245_v43 = vmul.f32 %v244_v29, %v139_v41  ;;  %v246_v44 = vmul.f32 %v244_v29, %v243_v42  ;;  %v248_v45 = vmul.f32 %v247_v32, %v139_v41  ;;  %v249_v46 = vmul.f32 %v247_v32, %v243_v42 }
  0x62   :  { %v263_v0 = vadd.f32 %v245_v43, %v24_v35  ;;  %v265_v47 = vadd.f32 %v449_v39, %v246_v44  ;;  %v293_v49 = vsub.f32 %v24_v35, %v245_v43  ;;  %v295_v50 = vsub.f32 %v449_v39, %v246_v44 }
  0x63   :  { %v333_v35 = vmul.f32 %v330_v52, %v322_v10 }
  0x64   :  { %v264_v53 = vsub.f32 %v263_v0, %v249_v46  ;;  %v266_v54 = vadd.f32 %v265_v47, %v248_v45  ;;  %v282_v57 = vadd.f32 %v263_v0, %v249_v46  ;;  %v283_v58 = vsub.f32 %v265_v47, %v248_v45 }
  0x65   :  { %v294_v63 = vadd.f32 %v293_v49, %v249_v46  ;;  %v296_v1 = vsub.f32 %v295_v50, %v248_v45  ;;  %v306_v9 = vsub.f32 %v293_v49, %v249_v46  ;;  %v307_v12 = vadd.f32 %v295_v50, %v248_v45 }
  0x66   :  { %v278_v61 = vmul.f32 %v277_v55, %v264_v53  ;;  %v280_v62 = vmul.f32 %v279_v56, %v266_v54  ;;  %v290_v7 = vmul.f32 %v282_v57, %v277_v55  ;;  %v291_v8 = vmul.f32 %v283_v58, %v279_v56 }
  0x67   :  { %v303_v16 = vmul.f32 %v294_v63, %v277_v55  ;;  %v304_v17 = vmul.f32 %v296_v1, %v279_v56  ;;  %v314_v24 = vmul.f32 %v306_v9, %v277_v55  ;;  %v268_v25 = vmul.f32 %v267_v2, %v264_v53 }
  0x68   :  { %v281_v15 = vadd.f32 %v280_v62, %v278_v61  ;;  %v292_v23 = vadd.f32 %v291_v8, %v290_v7  ;;  %v270_v26 = vmul.f32 %v269_v4, %v266_v54  ;;  %v315_v27 = vmul.f32 %v307_v12, %v279_v56 }
  0x69   :  { %v273_v29 = vmul.f32 %v272_v11, %v264_v53  ;;  %v275_v30 = vmul.f32 %v274_v19, %v266_v54  ;;  %v305_v31 = vadd.f32 %v304_v17, %v303_v16  ;;  %v284_v37 = vmul.f32 %v282_v57, %v267_v2 }
  0x6a   :  { %v339_v32 = vadd.f32 %v329_v18, %v281_v15  ;;  %v348_v36 = vadd.f32 %v336_v22, %v281_v15  ;;  %v316_v38 = vadd.f32 %v315_v27, %v314_v24  ;;  %v361_v39 = vadd.f32 %v329_v18, %v292_v23 }
  0x6b   :  { %v271_v40 = vadd.f32 %v270_v26, %v268_v25  ;;  %v285_v41 = vmul.f32 %v283_v58, %v269_v4  ;;  %v374_v42 = vadd.f32 %v336_v22, %v292_v23  ;;  %v276_v43 = vadd.f32 %v275_v30, %v273_v29 }
  0x6c   :  { %492 = vrcp.f32 %v339_v32  ;;  %v287_v44 = vmul.f32 %v282_v57, %v272_v11  ;;  %v387_v45 = vadd.f32 %v329_v18, %v305_v31  ;;  %v288_v46 = vmul.f32 %v283_v58, %v274_v19 }
  0x6d   :  { %494 = vrcp.f32 %v348_v36  ;;  %v297_v0 = vmul.f32 %v294_v63, %v267_v2  ;;  %v400_v47 = vadd.f32 %v336_v22, %v305_v31  ;;  %v298_v48 = vmul.f32 %v296_v1, %v269_v4 }
  0x6e   :  { %496 = vrcp.f32 %v361_v39  ;;  %v300_v49 = vmul.f32 %v294_v63, %v272_v11  ;;  %v413_v50 = vadd.f32 %v329_v18, %v316_v38  ;;  %v301_v51 = vmul.f32 %v296_v1, %v274_v19 }
  0x6f   :  { %498 = vrcp.f32 %v374_v42  ;;  %v308_v52 = vmul.f32 %v306_v9, %v267_v2  ;;  %v309_v53 = vmul.f32 %v307_v12, %v269_v4  ;;  %v311_v54 = vmul.f32 %v306_v9, %v272_v11 }
  0x70   :  { %500 = vrcp.f32 %v387_v45  ;;  %v312_v55 = vmul.f32 %v307_v12, %v274_v19  ;;  %v629_v56 = vadd.f32 %v336_v22, %v316_v38  ;;  %v286_v57 = vadd.f32 %v285_v41, %v284_v37 }
  0x71   :  { %502 = vrcp.f32 %v400_v47  ;;  %v289_v59 = vadd.f32 %v288_v46, %v287_v44  ;;  %v631_v60 = vadd.f32 %v333_v35, %v324_v3  ;;  %v299_v58 = vadd.f32 %v298_v48, %v297_v0 }
  0x72   :  { %504 = vrcp.f32 %v413_v50  ;;  %v302_v61 = vadd.f32 %v301_v51, %v300_v49  ;;  %v310_v62 = vadd.f32 %v309_v53, %v308_v52  ;;  %v337_v63 = vadd.f32 %v623_v28, %v271_v40 }
  0x73   :  { %v313_v6 = vadd.f32 %v312_v55, %v311_v54  ;;  %v338_v1 = vadd.f32 %v625_v33, %v276_v43  ;;  %v346_v2 = vadd.f32 %v627_v34, %v271_v40  ;;  %506 = vrcp.f32 %v629_v56 }
  0x74   :  { %v347_v8 = vadd.f32 %v631_v60, %v276_v43  ;;  %v359_v9 = vadd.f32 %v623_v28, %v286_v57  ;;  %v360_v10 = vadd.f32 %v625_v33, %v289_v59  ;;  %v372_v13 = vadd.f32 %v627_v34, %v286_v57 }
  0x75   :  { %v373_v14 = vadd.f32 %v631_v60, %v289_v59  ;;  %v385_v15 = vadd.f32 %v623_v28, %v299_v58  ;;  %v386_v19 = vadd.f32 %v625_v33, %v302_v61  ;;  %v398_v20 = vadd.f32 %v627_v34, %v299_v58 }
  0x76   :  { %v493_v5 = vpop.eup %492  ;;  %v399_v24 = vadd.f32 %v631_v60, %v302_v61  ;;  %v411_v3 = vadd.f32 %v623_v28, %v310_v62  ;;  %v412_v30 = vadd.f32 %v625_v33, %v313_v6  ;;  %v424_v37 = vadd.f32 %v627_v34, %v310_v62 }
  0x77   :  { %v495_v4 = vpop.eup %494  ;;  %v341_v7 = vmul.f32 %v493_v5, %v339_v32 }
  0x78   :  { %v497_v11 = vpop.eup %496  ;;  %v350_v12 = vmul.f32 %v495_v4, %v348_v36 }
  0x79   :  { %v499_v16 = vpop.eup %498  ;;  %v342_v17 = vsub.f32 2.0, %v341_v7  ;;  %v363_v18 = vmul.f32 %v497_v11, %v361_v39 }
  0x7a   :  { %v501_v21 = vpop.eup %500  ;;  %v351_v22 = vsub.f32 2.0, %v350_v12  ;;  %v376_v23 = vmul.f32 %v499_v16, %v374_v42 }
  0x7b   :  { %v503_v25 = vpop.eup %502  ;;  %v343_v26 = vmul.f32 %v493_v5, %v342_v17  ;;  %v364_v27 = vsub.f32 2.0, %v363_v18  ;;  %v389_v29 = vmul.f32 %v501_v21, %v387_v45  ;;  %v425_v5 = vadd.f32 %v631_v60, %v313_v6 }
  0x7c   :  { %v505_v31 = vpop.eup %504  ;;  %v352_v32 = vmul.f32 %v495_v4, %v351_v22  ;;  %v377_v35 = vsub.f32 2.0, %v376_v23  ;;  %v402_v36 = vmul.f32 %v503_v25, %v400_v47 }
  0x7d   :  { %v344_v38 = vmul.f32 %v343_v26, %v337_v63  ;;  %v345_v39 = vmul.f32 %v343_v26, %v338_v1  ;;  %v365_v40 = vmul.f32 %v497_v11, %v364_v27  ;;  %v390_v41 = vsub.f32 2.0, %v389_v29  ;;  %v507_v49 = vpop.eup %506 }
  0x7e   :  { %v353_v42 = vmul.f32 %v352_v32, %v346_v2  ;;  %v354_v43 = vmul.f32 %v352_v32, %v347_v8  ;;  %v378_v44 = vmul.f32 %v499_v16, %v377_v35  ;;  %v403_v28 = vsub.f32 2.0, %v402_v36 }
  0x7f   :  { %v366_v46 = vmul.f32 %v365_v40, %v359_v9  ;;  %v367_v0 = vmul.f32 %v365_v40, %v360_v10  ;;  %v391_v48 = vmul.f32 %v501_v21, %v390_v41  ;;  %v415_v45 = vmul.f32 %v505_v31, %v413_v50 }
  0x80   :  { %v355_v33 = vmin.f32 %v344_v38, %v353_v42  ;;  %v356_v51 = vmin.f32 %v345_v39, %v354_v43  ;;  %v357_v52 = vmax.f32 %v344_v38, %v353_v42  ;;  %v358_v53 = vmax.f32 %v345_v39, %v354_v43 }
  0x81   :  { %v379_v47 = vmul.f32 %v378_v44, %v372_v13  ;;  %v380_v54 = vmul.f32 %v378_v44, %v373_v14  ;;  %v392_v34 = vmul.f32 %v391_v48, %v385_v15  ;;  %v393_v55 = vmul.f32 %v391_v48, %v386_v19 }
  0x82   :  { %v368_v57 = vmin.f32 %v355_v33, %v366_v46  ;;  %v369_v59 = vmin.f32 %v356_v51, %v367_v0  ;;  %v370_v58 = vmax.f32 %v357_v52, %v366_v46  ;;  %v371_v61 = vmax.f32 %v358_v53, %v367_v0 }
  0x83   :  { %v404_v62 = vmul.f32 %v503_v25, %v403_v28  ;;  %v416_v63 = vsub.f32 2.0, %v415_v45  ;;  %v428_v1 = vmul.f32 %v507_v49, %v629_v56 }
  0x84   :  { %v381_v50 = vmin.f32 %v368_v57, %v379_v47  ;;  %v382_v2 = vmin.f32 %v369_v59, %v380_v54  ;;  %v383_v4 = vmax.f32 %v370_v58, %v379_v47  ;;  %v384_v7 = vmax.f32 %v371_v61, %v380_v54 }
  0x85   :  { %v405_v8 = vmul.f32 %v404_v62, %v398_v20  ;;  %v406_v9 = vmul.f32 %v404_v62, %v399_v24  ;;  %v417_v10 = vmul.f32 %v505_v31, %v416_v63  ;;  %v429_v11 = vsub.f32 2.0, %v428_v1 }
  0x86   :  { %v394_v12 = vmin.f32 %v381_v50, %v392_v34  ;;  %v395_v13 = vmin.f32 %v382_v2, %v393_v55  ;;  %v396_v14 = vmax.f32 %v383_v4, %v392_v34  ;;  %v397_v15 = vmax.f32 %v384_v7, %v393_v55 }
  0x87   :  { %v418_v16 = vmul.f32 %v417_v10, %v411_v3  ;;  %v419_v17 = vmul.f32 %v417_v10, %v412_v30  ;;  %v430_v18 = vmul.f32 %v507_v49, %v429_v11 }
  0x88   :  { %v407_v19 = vmin.f32 %v394_v12, %v405_v8  ;;  %v408_v21 = vmin.f32 %v395_v13, %v406_v9  ;;  %v409_v60 = vmax.f32 %v396_v14, %v405_v8  ;;  %v410_v6 = vmax.f32 %v397_v15, %v406_v9 }
  0x89   :  { %v431_v56 = vmul.f32 %v430_v18, %v424_v37  ;;  %v432_v22 = vmul.f32 %v430_v18, %v425_v5 }
  0x8a   :  { %v420_v23 = vmin.f32 %v407_v19, %v418_v16  ;;  %v421_v25 = vmin.f32 %v408_v21, %v419_v17  ;;  %v422_v26 = vmax.f32 %v409_v60, %v418_v16  ;;  %v423_v20 = vmax.f32 %v410_v6, %v419_v17 }
  0x8c   :  { %v433_v24 = vmin.f32 %v420_v23, %v431_v56  ;;  %v434_v27 = vmin.f32 %v421_v25, %v432_v22  ;;  %v435_v29 = vmax.f32 %v422_v26, %v431_v56  ;;  %v436_v31 = vmax.f32 %v423_v20, %v432_v22 }
  0x8e   :  { %437 = vst [vmem:[%s665_s2] sm:$0xff] %v433_v24  ;;  %474 = vst [vmem:[%s665_s2 + $0x8] sm:$0xff] %v434_v27 }
  0x8f   :  { %475 = vst [vmem:[%s665_s2 + $0x10] sm:$0xff] %v435_v29  ;;  %476 = vst [vmem:[%s665_s2 + $0x18] sm:$0xff] %v436_v31 }
  0x90   :  { %448 = vsyncpa [#allocation3], 1 }

</bundles_post_ra>
